<compile_context>
chip_gen: v5e
topology: v5e:2x2
jax: 0.10.0
libtpu: 0.0.40
codegen_flags: <defaults>
</compile_context>

<pallas_src>
import functools

import jax
import jax.numpy as jnp
from jax.experimental import pallas as pl
from jax.experimental.pallas import tpu as pltpu

_BN_EPS = 1e-5


def _round_up(v, m):
    return ((v + m - 1) // m) * m


def _choose_tiles(n, c, hw, itemsize, x_budget=4 << 20, acc_budget=4 << 20):
    """Pick (TN, TS, LANES).

    TS: full HW when HW <= 128, else a multiple of 128 (preferring one that
        divides HW exactly so no ragged-tile mask is needed), capped at 2048
        and shrunk so an 8-row slab of one x tile fits the budget.
    TN: bounded by the x-tile budget, the f32 partial-sum scratch budget and a
        hard cap of 256; always a multiple of 8 or the full batch; split into
        >= 2 blocks on the parallel axis when the batch allows (v7x megacore).
    """
    if hw <= 128:
        ts = hw
    else:
        cap = min((hw // 128) * 128, 2048)
        ts = cap
        for cand in range(cap, 127, -128):
            if hw % cand == 0:
                ts = cand
                break
        while ts > 128 and 8 * c * ts * itemsize > x_budget:
            ts -= 128

    lanes = min(ts, 128)
    tn = min(x_budget // max(1, c * ts * itemsize),       # streamed x tile
             acc_budget // max(1, c * lanes * 4),          # f32 partial-sum scratch
             256,                                          # epilogue intermediates
             n)
    tn = max(1, int(tn))
    if tn >= n:
        tn = n
        if n > 8:
            # v7x megacore: keep >= 2 blocks on the "parallel" batch axis.
            tn = _round_up(pl.cdiv(n, 2), 8)
    elif tn >= 8:
        tn = (tn // 8) * 8                                 # sublane-dense stores
    else:
        tn = min(8, n)                                     # never land in 2..7
    return int(tn), int(ts), int(lanes)


def _neck_kernel(x_ref, w0_ref, b0_ref, w1_ref, b1_ref, o_ref, acc_ref, *,
                 hw, ts, lanes, mask_spatial):
    s = pl.program_id(1)
    last = pl.num_programs(1) - 1

    # --- init the per-lane partial-sum accumulator on the first spatial tile ---
    @pl.when(s == 0)
    def _():
        acc_ref[...] = jnp.zeros_like(acc_ref)

    def accumulate(masked):
        xt = x_ref[...].astype(jnp.float32)                # (TN, C, TS)
        if masked:
            # Only reached on the last (ragged) spatial tile; mask is built from
            # a (1, 1, TS) iota and broadcast lane-wise.
            col = jax.lax.broadcasted_iota(jnp.int32, (1, 1, ts), 2) + s * ts
            xt = jnp.where(col < hw, xt, 0.0)
        # 128-aligned lane slices are tile-granular views, so this folding is
        # pure VPU vadds in the hot loop (no cross-lane XLU work).
        part = xt[:, :, 0:lanes]
        for k in range(1, ts // lanes):
            part = part + xt[:, :, k * lanes:(k + 1) * lanes]
        acc_ref[...] += part                               # (TN, C, LANES) f32

    if mask_spatial:
        @pl.when(s != last)
        def _():
            accumulate(False)

        @pl.when(s == last)
        def _():
            accumulate(True)
    else:
        accumulate(False)

    # --- epilogue on the last spatial tile: fc0(+BN folded) -> relu -> fc1 ----
    @pl.when(s == last)
    def _():
        # Single cross-lane reduce per batch tile.
        pooled = jnp.sum(acc_ref[...], axis=-1)            # (TN, C) raw spatial sum
        # w0 already has the BN scale, (b0 - mean) * scale bias and 1/HW folded in.
        h = jnp.dot(pooled, w0_ref[...].astype(jnp.float32),
                    preferred_element_type=jnp.float32) + b0_ref[...]
        h = jnp.maximum(h, 0.0)
        # TODO(synk): nn.Dropout() is identity in eval mode; training-mode random
        # masking / 1/(1-p) scaling is not reproduced.
        y = jnp.dot(h, w1_ref[...].astype(jnp.float32),
                    preferred_element_type=jnp.float32) + b1_ref[...]
        o_ref[...] = jnp.maximum(y, 0.0).astype(o_ref.dtype)


def init_params(key, in_channels, hid_channels, out_channels):
    """Deterministic PyTorch-Linear-style init (uniform(-1/sqrt(fan_in), +))."""
    k0w, k0b, k1w, k1b = jax.random.split(key, 4)
    bound0 = 1.0 / jnp.sqrt(in_channels)
    bound1 = 1.0 / jnp.sqrt(hid_channels)
    w0 = jax.random.uniform(k0w, (hid_channels, in_channels), jnp.float32, -bound0, bound0)
    b0 = jax.random.uniform(k0b, (hid_channels,), jnp.float32, -bound0, bound0)
    w1 = jax.random.uniform(k1w, (out_channels, hid_channels), jnp.float32, -bound1, bound1)
    b1 = jax.random.uniform(k1b, (out_channels,), jnp.float32, -bound1, bound1)
    # BatchNorm1d running stats at init: mean=0, var=1 (affine=False -> no gamma/beta)
    running_mean = jnp.zeros((hid_channels,), jnp.float32)
    running_var = jnp.ones((hid_channels,), jnp.float32)
    return w0, b0, w1, b1, running_mean, running_var


def nonlinear_neck_v0(x_list, params, weight_dtype=jnp.bfloat16):
    assert len(x_list) == 1
    x = x_list[0]                                   # (N, C, H, W), NCHW
    n, c, h, w = x.shape
    hw = h * w
    x2 = x.reshape(n, c, hw)                        # stream in native dtype

    w0, b0, w1, b1, rm, rv = params
    hid = w0.shape[0]
    out_ch = w1.shape[0]

    # Fold eval-mode BN(affine=False) + the 1/HW mean scale into fc0; pre-transpose.
    scale = jax.lax.rsqrt(rv.astype(jnp.float32) + _BN_EPS)             # (hid,)
    w0p = (w0.astype(jnp.float32).T * scale[None, :]) / float(hw)       # (C, hid)
    b0p = (b0.astype(jnp.float32) - rm.astype(jnp.float32)) * scale     # (hid,)
    w1p = w1.astype(jnp.float32).T                                      # (hid, out)
    b1p = b1.astype(jnp.float32)

    # Pad hid/out to multiples of 128 lanes (zero pads keep math identical);
    # store the (large) weights in bf16, keep the (tiny) biases in f32.
    hid_pad = _round_up(hid, 128)
    out_pad = _round_up(out_ch, 128)
    w0p = jnp.pad(w0p, ((0, 0), (0, hid_pad - hid))).astype(weight_dtype)
    b0p = jnp.pad(b0p, ((0, hid_pad - hid),)).reshape(1, hid_pad)
    w1p = jnp.pad(w1p, ((0, hid_pad - hid), (0, out_pad - out_ch))).astype(weight_dtype)
    b1p = jnp.pad(b1p, ((0, out_pad - out_ch),)).reshape(1, out_pad)

    itemsize = jnp.dtype(x2.dtype).itemsize
    wbytes = jnp.dtype(weight_dtype).itemsize
    tn, ts, lanes = _choose_tiles(n, c, hw, itemsize)
    grid = (pl.cdiv(n, tn), pl.cdiv(hw, ts))
    mask_spatial = (hw % ts) != 0

    kernel = functools.partial(_neck_kernel, hw=hw, ts=ts, lanes=lanes,
                               mask_spatial=mask_spatial)

    # Size the scoped VMEM from what the kernel actually uses (v7x: 64 MiB/TC).
    c_pad8 = _round_up(c, 8)
    x_bytes = 2 * tn * c_pad8 * ts * itemsize                       # double-buffered stream
    w_bytes = 2 * ((c_pad8 * hid_pad + hid_pad * out_pad) * wbytes
                   + (hid_pad + out_pad) * 4 * 8)
    out_bytes = 2 * _round_up(tn, 8) * out_pad * 4
    acc_bytes = tn * c_pad8 * _round_up(lanes, 128) * 4
    epi_bytes = tn * (c_pad8 + 2 * hid_pad + 2 * out_pad) * 4
    vmem_limit = int(min(max(x_bytes + w_bytes + out_bytes + acc_bytes
                             + epi_bytes + (4 << 20), 16 << 20), 56 << 20))

    flops = 2 * n * (c * hid_pad + hid_pad * out_pad) + n * c * hw
    bytes_accessed = (x2.size * itemsize
                      + (w0p.size + w1p.size) * wbytes
                      + (b0p.size + b1p.size) * 4
                      + n * out_pad * 4)

    out = pl.pallas_call(
        kernel,
        out_shape=jax.ShapeDtypeStruct((n, out_pad), jnp.float32),
        grid_spec=pltpu.PrefetchScalarGridSpec(
            num_scalar_prefetch=0,
            grid=grid,
            in_specs=[
                pl.BlockSpec((tn, c, ts), lambda i, s: (i, 0, s)),      # x tiles
                pl.BlockSpec((c, hid_pad), lambda i, s: (0, 0)),        # fc0 W (resident)
                pl.BlockSpec((1, hid_pad), lambda i, s: (0, 0)),        # fc0 b
                pl.BlockSpec((hid_pad, out_pad), lambda i, s: (0, 0)),  # fc1 W
                pl.BlockSpec((1, out_pad), lambda i, s: (0, 0)),        # fc1 b
            ],
            out_specs=pl.BlockSpec((tn, out_pad), lambda i, s: (i, 0)),
            scratch_shapes=[pltpu.VMEM((tn, c, lanes), jnp.float32)],
        ),
        compiler_params=pltpu.CompilerParams(
            dimension_semantics=("parallel", "arbitrary"),
            vmem_limit_bytes=vmem_limit,
        ),
        cost_estimate=pl.CostEstimate(
            flops=flops, transcendentals=0, bytes_accessed=bytes_accessed),
    )(x2, w0p, b0p, w1p, b1p)

    return [out[:, :out_ch]]


def _reference(x_list, params):
    """Pure-JAX reference mirroring PyTorch eval-mode forward (f32 weights)."""
    (x,) = x_list
    w0, b0, w1, b1, rm, rv = params
    pooled = jnp.mean(x.astype(jnp.float32), axis=(2, 3))        # avgpool + view
    h = pooled @ w0.T + b0
    h = (h - rm) / jnp.sqrt(rv + _BN_EPS)
    h = jnp.maximum(h, 0.0)
    y = h @ w1.T + b1
    return [jnp.maximum(y, 0.0)]


if __name__ == "__main__":
    in_channels, hid_channels, out_channels = 4, 32, 8
    N, H, W = 2, 16, 16

    key = jax.random.PRNGKey(0)
    kx, kp = jax.random.split(key)
    x = jax.random.normal(kx, (N, in_channels, H, W), jnp.float32)
    params = init_params(kp, in_channels, hid_channels, out_channels)

    out = nonlinear_neck_v0([x], params)
    out = [jax.block_until_ready(o) for o in out]

    ref = _reference([x], params)
    assert out[0].shape == (N, out_channels)
    # Weights are stored bf16 in the kernel (perf-review item); compare against
    # the f32 reference at bf16-level tolerance.
    assert jnp.allclose(out[0], ref[0], atol=2e-2, rtol=2e-2)
    # Exactness check with f32 weights as well.
    out_f32 = nonlinear_neck_v0([x], params, weight_dtype=jnp.float32)
    assert jnp.allclose(out_f32[0], ref[0], atol=1e-5, rtol=1e-5)

    print("KERNEL_OK")
</pallas_src>

<mosaic_0001>
module attributes {stable_mosaic.version = 11 : i64} {
  func.func @_neck_kernel(%arg0: i32, %arg1: i32, %arg2: memref<2x4x256xf32, #tpu.memory_space<vmem>>, %arg3: memref<4x128xbf16, #tpu.memory_space<vmem>>, %arg4: memref<1x128xf32, #tpu.memory_space<vmem>>, %arg5: memref<128x128xbf16, #tpu.memory_space<vmem>>, %arg6: memref<1x128xf32, #tpu.memory_space<vmem>>, %arg7: memref<2x128xf32, #tpu.memory_space<vmem>>, %arg8: memref<2x4x128xf32, #tpu.memory_space<vmem>>) attributes {dimension_semantics = [#tpu.dimension_semantics<parallel>, #tpu.dimension_semantics<arbitrary>], iteration_bounds = array<i64: 1, 1>, scalar_prefetch = 0 : i64, scratch_operands = 1 : i64, tpu.core_type = #tpu.core_type<tc>, window_params = [{transform_indices = @transform_0, window_bounds = array<i64: 2, 4, 256>}, {pipeline_mode = #tpu.pipeline_mode<synchronous>, transform_indices = @transform_1, window_bounds = array<i64: 4, 128>}, {pipeline_mode = #tpu.pipeline_mode<synchronous>, transform_indices = @transform_2, window_bounds = array<i64: 1, 128>}, {pipeline_mode = #tpu.pipeline_mode<synchronous>, transform_indices = @transform_3, window_bounds = array<i64: 128, 128>}, {pipeline_mode = #tpu.pipeline_mode<synchronous>, transform_indices = @transform_4, window_bounds = array<i64: 1, 128>}, {transform_indices = @transform_5, window_bounds = array<i64: 2, 128>}]} {
    %c0_i32 = arith.constant 0 : i32
    %0 = arith.cmpi eq, %arg1, %c0_i32 : i32
    %1 = arith.extui %0 : i1 to i32
    %c0_i32_0 = arith.constant 0 : i32
    %2 = arith.cmpi ne, %1, %c0_i32_0 : i32
    scf.if %2 {
      %cst = arith.constant 0.000000e+00 : f32
      %13 = vector.broadcast %cst : f32 to vector<2x4x128xf32>
      %c0_11 = arith.constant 0 : index
      %c0_12 = arith.constant 0 : index
      %c0_13 = arith.constant 0 : index
      %14 = vector.load %arg8[%c0_11, %c0_12, %c0_13] : memref<2x4x128xf32, #tpu.memory_space<vmem>>, vector<2x4x128xf32>
      tpu.vector_store %arg8[%c0_11, %c0_12, %c0_13], %13 {strides = array<i32>} : memref<2x4x128xf32, #tpu.memory_space<vmem>>, vector<2x4x128xf32>,
    } else {
    }
    %c0 = arith.constant 0 : index
    %c0_1 = arith.constant 0 : index
    %c0_2 = arith.constant 0 : index
    %3 = vector.load %arg2[%c0, %c0_1, %c0_2] : memref<2x4x256xf32, #tpu.memory_space<vmem>>, vector<2x4x256xf32>
    %4 = vector.extract_strided_slice %3 {offsets = [0, 0, 0], sizes = [2, 4, 128], strides = [1, 1, 1]} : vector<2x4x256xf32> to vector<2x4x128xf32>
    %5 = vector.extract_strided_slice %3 {offsets = [0, 0, 128], sizes = [2, 4, 128], strides = [1, 1, 1]} : vector<2x4x256xf32> to vector<2x4x128xf32>
    %6 = arith.addf %4, %5 : vector<2x4x128xf32>
    %c0_3 = arith.constant 0 : index
    %c0_4 = arith.constant 0 : index
    %c0_5 = arith.constant 0 : index
    %7 = vector.load %arg8[%c0_3, %c0_4, %c0_5] : memref<2x4x128xf32, #tpu.memory_space<vmem>>, vector<2x4x128xf32>
    %8 = arith.addf %7, %6 : vector<2x4x128xf32>
    %c0_6 = arith.constant 0 : index
    %c0_7 = arith.constant 0 : index
    %c0_8 = arith.constant 0 : index
    %9 = vector.load %arg8[%c0_6, %c0_7, %c0_8] : memref<2x4x128xf32, #tpu.memory_space<vmem>>, vector<2x4x128xf32>
    tpu.vector_store %arg8[%c0_6, %c0_7, %c0_8], %8 {strides = array<i32>} : memref<2x4x128xf32, #tpu.memory_space<vmem>>, vector<2x4x128xf32>,
    %c0_i32_9 = arith.constant 0 : i32
    %10 = arith.cmpi eq, %arg1, %c0_i32_9 : i32
    %11 = arith.extui %10 : i1 to i32
    %c0_i32_10 = arith.constant 0 : i32
    %12 = arith.cmpi ne, %11, %c0_i32_10 : i32
    scf.if %12 {
      %c0_11 = arith.constant 0 : index
      %c0_12 = arith.constant 0 : index
      %c0_13 = arith.constant 0 : index
      %13 = vector.load %arg8[%c0_11, %c0_12, %c0_13] : memref<2x4x128xf32, #tpu.memory_space<vmem>>, vector<2x4x128xf32>
      %cst = arith.constant dense<0.000000e+00> : vector<2x4xf32>
      %14 = vector.multi_reduction <add>, %13, %cst [2] : vector<2x4x128xf32> to vector<2x4xf32>
      %c0_14 = arith.constant 0 : index
      %c0_15 = arith.constant 0 : index
      %15 = vector.load %arg3[%c0_14, %c0_15] : memref<4x128xbf16, #tpu.memory_space<vmem>>, vector<4x128xbf16>
      %16 = arith.extf %15 : vector<4x128xbf16> to vector<4x128xf32>
      %cst_16 = arith.constant dense<0.000000e+00> : vector<2x128xf32>
      %17 = tpu.matmul %14, %16, %cst_16 {dimension_numbers = #tpu.dot_dimension_numbers<[1], [0], [0], [1], [0, 0, 1, 1], [], []>} : vector<2x4xf32>, vector<4x128xf32>, vector<2x128xf32> -> vector<2x128xf32>
      %c0_17 = arith.constant 0 : index
      %c0_18 = arith.constant 0 : index
      %18 = vector.load %arg4[%c0_17, %c0_18] : memref<1x128xf32, #tpu.memory_space<vmem>>, vector<1x128xf32>
      %19 = vector.broadcast %18 : vector<1x128xf32> to vector<2x128xf32>
      %20 = arith.addf %17, %19 : vector<2x128xf32>
      %cst_19 = arith.constant 0.000000e+00 : f32
      %21 = vector.broadcast %cst_19 : f32 to vector<2x128xf32>
      %22 = arith.maximumf %20, %21 : vector<2x128xf32>
      %c0_20 = arith.constant 0 : index
      %c0_21 = arith.constant 0 : index
      %23 = vector.load %arg5[%c0_20, %c0_21] : memref<128x128xbf16, #tpu.memory_space<vmem>>, vector<128x128xbf16>
      %24 = arith.extf %23 : vector<128x128xbf16> to vector<128x128xf32>
      %cst_22 = arith.constant dense<0.000000e+00> : vector<2x128xf32>
      %25 = tpu.matmul %22, %24, %cst_22 {dimension_numbers = #tpu.dot_dimension_numbers<[1], [0], [0], [1], [0, 0, 1, 1], [], []>} : vector<2x128xf32>, vector<128x128xf32>, vector<2x128xf32> -> vector<2x128xf32>
      %c0_23 = arith.constant 0 : index
      %c0_24 = arith.constant 0 : index
      %26 = vector.load %arg6[%c0_23, %c0_24] : memref<1x128xf32, #tpu.memory_space<vmem>>, vector<1x128xf32>
      %27 = vector.broadcast %26 : vector<1x128xf32> to vector<2x128xf32>
      %28 = arith.addf %25, %27 : vector<2x128xf32>
      %cst_25 = arith.constant 0.000000e+00 : f32
      %29 = vector.broadcast %cst_25 : f32 to vector<2x128xf32>
      %30 = arith.maximumf %28, %29 : vector<2x128xf32>
      %c0_26 = arith.constant 0 : index
      %c0_27 = arith.constant 0 : index
      %31 = vector.load %arg7[%c0_26, %c0_27] : memref<2x128xf32, #tpu.memory_space<vmem>>, vector<2x128xf32>
      tpu.vector_store %arg7[%c0_26, %c0_27], %30 {strides = array<i32>} : memref<2x128xf32, #tpu.memory_space<vmem>>, vector<2x128xf32>,
    } else {
    }
    return
  }
  func.func @transform_0(%arg0: i32, %arg1: i32) -> (i32, i32, i32) {
    %c0_i32 = arith.constant 0 : i32
    %c0_i32_0 = arith.constant 0 : i32
    return %arg0, %c0_i32, %arg1 : i32, i32, i32
  }
  func.func @transform_1(%arg0: i32, %arg1: i32) -> (i32, i32) {
    %c0_i32 = arith.constant 0 : i32
    %c0_i32_0 = arith.constant 0 : i32
    %c0_i32_1 = arith.constant 0 : i32
    return %c0_i32, %c0_i32_0 : i32, i32
  }
  func.func @transform_2(%arg0: i32, %arg1: i32) -> (i32, i32) {
    %c0_i32 = arith.constant 0 : i32
    %c0_i32_0 = arith.constant 0 : i32
    %c0_i32_1 = arith.constant 0 : i32
    return %c0_i32, %c0_i32_0 : i32, i32
  }
  func.func @transform_3(%arg0: i32, %arg1: i32) -> (i32, i32) {
    %c0_i32 = arith.constant 0 : i32
    %c0_i32_0 = arith.constant 0 : i32
    %c0_i32_1 = arith.constant 0 : i32
    return %c0_i32, %c0_i32_0 : i32, i32
  }
  func.func @transform_4(%arg0: i32, %arg1: i32) -> (i32, i32) {
    %c0_i32 = arith.constant 0 : i32
    %c0_i32_0 = arith.constant 0 : i32
    %c0_i32_1 = arith.constant 0 : i32
    return %c0_i32, %c0_i32_0 : i32, i32
  }
  func.func @transform_5(%arg0: i32, %arg1: i32) -> (i32, i32) {
    %c0_i32 = arith.constant 0 : i32
    %c0_i32_0 = arith.constant 0 : i32
    return %arg0, %c0_i32 : i32, i32
  }
}

</mosaic_0001>

<bundles_post_ra>
// kernel: tpu_custom_call.1
= control target key start
LH: loop header
LB: loop body
LE: loop exit
PB: predicated region body
PF: predicated region fallthrough
CT: control target
= control target key end

     0   :  { %10 = vsyncpa [#allocation4], 0  ;;  %s428_s0 = inlined_call_operand.hbm [shape: f32[2,4,256], index: 0, kind: input, shape index: {}]   ;;  %s429_s1 = inlined_call_operand.hbm [shape: bf16[4,128], index: 1, kind: input, shape index: {}]   ;;  %s430_s2 = inlined_call_operand.vmem [shape: f32[1,128], index: 2, kind: input, shape index: {}]   ;;  %s431_s3 = inlined_call_operand.hbm [shape: bf16[128,128], index: 3, kind: input, shape index: {}]   ;;  %s432_s4 = inlined_call_operand.vmem [shape: f32[1,128], index: 4, kind: input, shape index: {}]   ;;  %s433_s5 = inlined_call_operand.hbm [shape: f32[2,128], index: 5, kind: output, shape index: {}]  }
   0x1   :  { %11 = vsyncpa [#allocation7], 0  ;;  %s31_s20 = sshll.u32 %s429_s1, 4  ;;  %s32_s20 = int_to_ptr.hbm [resolvable:$true] %s31_s20 }
   0x2   :  { %12 = vsyncpa [#allocation5], 0  ;;  %s371_s21 = smov [#allocation6]   ;;  %s17_s25 = sshll.u32 %s428_s0, 4  ;;  %s18_s25 = int_to_ptr.hbm [resolvable:$true] %s17_s25 }
   0x3   :  { %s33_s22 = sshll.u32 %s371_s21, 4  ;;  %s372_s26 = smov [#allocation3]   ;;  %s34_s22 = int_to_ptr.vmem [resolvable:$true] %s33_s22 }
   0x4   :  { %36 = dma.hbm_to_vmem [thread:$0]  %s32_s20, 32, %s34_s22, [#allocation7]  }
   0x5   :  { %s19_s27 = sshll.u32 %s372_s26, 4  ;;  %s373_s28 = smov 128   ;;  %s20_s27 = int_to_ptr.vmem [resolvable:$true] %s19_s27 }
   0x6   :  { %s374_s29 = smov 8   ;;  %s43_s1 = sshll.u32 %s431_s3, 4  ;;  %s44_s1 = int_to_ptr.hbm [resolvable:$true] %s43_s1 }
   0x7   :  { %25 = dma.hbm_to_vmem [thread:$0]  %s18_s25, 256, %s20_s27, [#allocation4], %s373_s28, %s373_s28, %s374_s29  }
   0x8   :  { %s375_s7 = smov [#allocation8]   ;;  %s376_s9 = smov 64  }
   0x9   :  { %s45_s8 = sshll.u32 %s375_s7, 4  ;;  %s377_s10 = smov 4   ;;  %s46_s8 = int_to_ptr.vmem [resolvable:$true] %s45_s8 }
   0xa   :  { %51 = dma.hbm_to_vmem [thread:$0]  %s44_s1, 1024, %s46_s8, [#allocation7], %s376_s9, %s376_s9, %s377_s10  }
   0xb   :  { %365 = dma.done.wait [#allocation4], 256  }
   0xc   :  { %366 = vsyncadd [#allocation4], 4294967040 }
   0xd   :  { %367 = dma.done.wait [#allocation7], 1056  }
   0xe   :  { %368 = vsyncadd [#allocation7], 4294966240  ;;  %v378_v0 = vmov 0.0   ;;  %v72_v1 = vld [vmem:[#allocation3] sm:$0xff]  ;;  %v73_v2 = vld [vmem:[#allocation3 + $0x8] sm:$0xff]  ;;  %vm93_vm0 = vcmask 1043456   ;;  %v108_v36 = vlaneseq }
   0xf   :  { %70 = vst [vmem:[#allocation2] sm:$0xf] %v378_v0  ;;  %v76_v3 = vrot.slane %v72_v1, 4  ;;  %v77_v4 = vrot.slane %v73_v2, 4  ;;  %v100_v15 = vld [vmem:[#allocation6] sm:$0x3] }
  0x10   :  { %71 = vst [vmem:[#allocation2 + $0x4] sm:$0xf] %v378_v0  ;;  %v101_v16 = vunpack.c.l.bf16 %v100_v15  ;;  %v257_v17 = vld [vmem:[#allocation8 + $0x38] sm:$0xff]   ;;  %v256_v18 = vld [vmem:[#allocation8 + $0x30] sm:$0xff]   ;;  %v255_v22 = vld [vmem:[#allocation8 + $0x28] sm:$0xff]   ;;  %v109_v39 = vand.u32 127, %v108_v36 }
  0x11   :  { %v80_v7 = vadd.f32 %v76_v3, %v72_v1  ;;  %v81_v8 = vadd.f32 %v77_v4, %v73_v2  ;;  %v250_v19 = vunpack.c.h.bf16 %v257_v17  ;;  %v249_v20 = vunpack.c.l.bf16 %v257_v17  ;;  %v254_v25 = vld [vmem:[#allocation8 + $0x20] sm:$0xff]   ;;  %v253_v28 = vld [vmem:[#allocation8 + $0x18] sm:$0xff]   ;;  %v252_v31 = vld [vmem:[#allocation8 + $0x10] sm:$0xff]   ;;  %s379_s13 = smov [#allocation9]   ;;  %s206_s17 = sshll.u32 %s433_s5, 4  ;;  %s207_s17 = int_to_ptr.hbm [resolvable:$true] %s206_s17 }
  0x12   :  { %217 = vmatpush.msk.msra.mxu0 %vm93_vm0, %v101_v16  ;;  %v246_v21 = vunpack.c.h.bf16 %v256_v18  ;;  %v245_v23 = vunpack.c.l.bf16 %v256_v18  ;;  %v242_v24 = vunpack.c.h.bf16 %v255_v22  ;;  %v241_v26 = vunpack.c.l.bf16 %v255_v22  ;;  %v251_v35 = vld [vmem:[#allocation8 + $0x8] sm:$0xff]   ;;  %v220_v45 = vld [vmem:[#allocation8] sm:$0xff]   ;;  %s204_s14 = sshll.u32 %s379_s13, 4  ;;  %s205_s14 = int_to_ptr.vmem [resolvable:$true] %s204_s14 }
  0x13   :  { %177 = vmatpush.msra.mxu1 %v250_v19  ;;  %v238_v27 = vunpack.c.h.bf16 %v254_v25  ;;  %v237_v29 = vunpack.c.l.bf16 %v254_v25  ;;  %v234_v30 = vunpack.c.h.bf16 %v253_v28  ;;  %v233_v32 = vunpack.c.l.bf16 %v253_v28  ;;  %v267_v48 = vld [vmem:[%s430_s2] ss:$0 sm:$0xff] }
  0x14   :  { %v230_v33 = vunpack.c.h.bf16 %v252_v31  ;;  %v229_v37 = vunpack.c.l.bf16 %v252_v31  ;;  %v226_v38 = vunpack.c.h.bf16 %v251_v35  ;;  %vm112_vm1 = vcmask 1041409   ;;  %v268_v52 = vld [vmem:[%s432_s4] ss:$0 sm:$0xff] }
  0x15   :  { %178 = vmatpush.msra.mxu1 %v249_v20  ;;  %vm114_vm2 = vcmask 31744   ;;  %v225_v44 = vunpack.c.l.bf16 %v251_v35  ;;  %v222_v46 = vunpack.c.h.bf16 %v220_v45  ;;  %v221_v47 = vunpack.c.l.bf16 %v220_v45 }
  0x16   :  { %v82_v5 = vld [vmem:[#allocation2] sm:$0xf] }
  0x17   :  { %v83_v6 = vld [vmem:[#allocation2 + $0x4] sm:$0xf]  ;;  %v84_v9 = vadd.f32 %v82_v5, %v80_v7  ;;  %179 = vmatpush.msra.mxu1 %v246_v21 }
  0x18   :  { %v85_v10 = vadd.f32 %v83_v6, %v81_v8 }
  0x19   :  { %86 = vst [vmem:[#allocation2] sm:$0xf] %v84_v9  ;;  %180 = vmatpush.msra.mxu1 %v245_v23 }
  0x1a   :  { %87 = vst [vmem:[#allocation2 + $0x4] sm:$0xf] %v85_v10 }
  0x1b   :  { %181 = vmatpush.msra.mxu1 %v242_v24 }
  0x1d   :  { %182 = vmatpush.msra.mxu1 %v241_v26 }
  0x1f   :  { %183 = vmatpush.msra.mxu1 %v238_v27 }
  0x20   :  { %v91_v11 = vld [vmem:[#allocation2] sm:$0xf] }
  0x21   :  { %v94_v12 = vsel %vm93_vm0, %v91_v11, 0.0  ;;  %v92_v13 = vld [vmem:[#allocation2 + $0x4] sm:$0xf]  ;;  %184 = vmatpush.msra.mxu1 %v237_v29 }
  0x22   :  { %95 = vadd.xlane.f32.xlu0 %v94_v12  ;;  %v97_v14 = vsel %vm93_vm0, %v92_v13, 0.0 }
  0x23   :  { %185 = vmatpush.msra.mxu1 %v234_v30 }
  0x25   :  { %186 = vmatpush.msra.mxu1 %v233_v32 }
  0x27   :  { %187 = vmatpush.msra.mxu1 %v230_v33 }
  0x29   :  { %188 = vmatpush.msra.mxu1 %v229_v37 }
  0x2a   :  { %98 = vadd.xlane.f32.xlu0 %v97_v14 }
  0x2b   :  { %189 = vmatpush.msra.mxu1 %v226_v38 }
  0x2d   :  { %190 = vmatpush.msra.mxu1 %v225_v44 }
  0x2f   :  { %191 = vmatpush.msra.mxu1 %v222_v46 }
  0x31   :  { %192 = vmatpush.msra.mxu1 %v221_v47 }
  0x95   :  { %v96_v34 = vpop.xlane.xlu0 %95 }
  0x96   :  { %v110_v41 = vperm.slane %v96_v34, %v109_v39 }
  0x9d   :  { %v99_v40 = vpop.xlane.xlu0 %98 }
  0x9e   :  { %v111_v42 = vperm.slane %v99_v40, %v109_v39 }
  0xa0   :  { %v113_v43 = vsel %vm112_vm1, %v111_v42, %v110_v41 }
  0xa1   :  { %218 = vmatmul.msk.f32.vlgmr.msra.gmra.mxu0 %vm114_vm2, %v113_v43 }
 0x11e   :  { %v137_v49 = vpop.f32.mrf.mxu0 }
 0x11f   :  { %v138_v50 = vadd.f32 %v267_v48, %v137_v49 }
 0x121   :  { %v140_v51 = vmax.f32 %v138_v50, 0.0 }
 0x123   :  { %193 = vmatmul.f32.vlgmr.msra.gmra.mxu1 %v140_v51 }
 0x1a0   :  { %v194_v53 = vpop.f32.mrf.mxu1 }
 0x1a1   :  { %v195_v54 = vadd.f32 %v268_v52, %v194_v53 }
 0x1a3   :  { %v197_v55 = vmax.f32 %v195_v54, 0.0 }
 0x1a5   :  { %198 = vst [vmem:[#allocation9] sm:$0x3] %v197_v55 }
 0x1a6   :  { %209 = dma.vmem_to_hbm [thread:$0]  %s205_s14, 32, %s207_s17, [#allocation5]  }
 0x1a7   :  { %369 = dma.done.wait [#allocation5], 32  }
 0x1a8   :  { %370 = vsyncadd [#allocation5], 4294967264 }
 0x1a9   :  { %214 = vsyncpa [#allocation4], 1 }
 0x1aa   :  { %215 = vsyncpa [#allocation7], 1 }
 0x1ab   :  { %216 = vsyncpa [#allocation5], 1 }

</bundles_post_ra>
